<compile_context>
chip_gen: v7x
topology: tpu7x:2x2x1
jax: 0.10.0
libtpu: 0.0.40
codegen_flags: <defaults>
</compile_context>

<pallas_src>
import math

import numpy as np

import jax
import jax.numpy as jnp
from jax.experimental import pallas as pl
from jax.experimental.pallas import tpu as pltpu

LANE = 128  # TPU vreg lane width (f32)


def _round_up(n, m):
    return ((n + m - 1) // m) * m


def _fused_addrnn_kernel(xaug_ref, h_ref, wx_ref, wh_ref, xres_ref,
                         y_ref, h_out_ref):
    """One fused AddRnn step on lane-dense tiles.

    xaug_ref : (1, S_pad)       [x_flat, 1, 0...]; the 1 activates the bias row of Wx
    h_ref    : (1, H_pad)       persistent hidden state (zeros in the lane padding)
    wx_ref   : (S_pad, tile_h)  [W_ih^T ; b_ih+b_hh ; 0] column tile
    wh_ref   : (H_pad, tile_h)  [W_hh^T ; 0]             column tile
    xres_ref : (1, tile_h)      x lanes of this output tile (residual add)
    y_ref    : (1, tile_h)      x + tanh(pre)   (fused residual output row)
    h_out_ref: (1, tile_h)      tanh(pre)       (new hidden, aliased onto h in HBM)

    Padded lanes of h_out are exactly tanh(0) = 0 (zero W columns / bias), so the
    stored padded hidden state stays clean across steps.  Padded lanes of y are
    sliced off outside the kernel.
    """
    # NOTE: default MXU precision; add precision=jax.lax.Precision.HIGHEST to the
    # dots below if bit-closer torch parity is ever needed (negligible cost here).
    pre = jnp.dot(xaug_ref[...], wx_ref[...], preferred_element_type=jnp.float32)
    pre = pre + jnp.dot(h_ref[...], wh_ref[...], preferred_element_type=jnp.float32)
    h_new = jnp.tanh(pre)
    h_out_ref[...] = h_new
    y_ref[...] = xres_ref[...] + h_new


class AddRnnPallas:
    """JAX/Pallas port of yolot/rnn.py::AddRnn (forward pass only)."""

    def __init__(self, input_shape, scaling_factor, seed=0):
        self.scaling_factor = int(scaling_factor)
        self.input_shape = tuple(int(d) for d in input_shape)

        rnn_out = list(self.input_shape)
        rnn_out[-2:] = [d * 2 / scaling_factor for d in rnn_out[-2:]]
        assert all(float(d).is_integer() for d in rnn_out), \
            "rnn_output_shape must have integral dims"
        self.rnn_output_shape = tuple(int(round(float(d))) for d in rnn_out)
        self.hidden_size = int(math.prod(self.rnn_output_shape))
        self.size = int(math.prod(self.input_shape))
        self.resize_output = self.rnn_output_shape != self.input_shape

        # Rnn.forward reshapes the (1, hidden_size) RNN output to input_shape.
        assert self.hidden_size == self.size, (
            "Rnn.forward reshapes the (1, hidden_size) output to input_shape; "
            "hidden_size must equal prod(input_shape) (i.e. scaling_factor == 2).")

        # ---- nn.RNN default init: U(-1/sqrt(H), 1/sqrt(H)) for all params ----
        k = 1.0 / math.sqrt(self.hidden_size)
        keys = jax.random.split(jax.random.PRNGKey(seed), 4)
        self.w_ih = jax.random.uniform(keys[0], (self.hidden_size, self.size),
                                       jnp.float32, minval=-k, maxval=k)
        self.w_hh = jax.random.uniform(keys[1], (self.hidden_size, self.hidden_size),
                                       jnp.float32, minval=-k, maxval=k)
        self.b_ih = jax.random.uniform(keys[2], (self.hidden_size,), jnp.float32,
                                       minval=-k, maxval=k)
        self.b_hh = jax.random.uniform(keys[3], (self.hidden_size,), jnp.float32,
                                       minval=-k, maxval=k)

        # ---- lane-dense padded operands (bias folded into Wx) ----
        self.s_pad = _round_up(self.size + 1, LANE)    # +1 lane for the bias "1"
        self.h_pad = _round_up(self.hidden_size, LANE)

        wx = jnp.zeros((self.s_pad, self.h_pad), jnp.float32)
        wx = wx.at[:self.size, :self.hidden_size].set(jnp.transpose(self.w_ih))
        wx = wx.at[self.size, :self.hidden_size].set(self.b_ih + self.b_hh)
        self._wx = wx
        wh = jnp.zeros((self.h_pad, self.h_pad), jnp.float32)
        wh = wh.at[:self.hidden_size, :self.hidden_size].set(jnp.transpose(self.w_hh))
        self._wh = wh
        # (Review) at large H, cast self._wx/self._wh (and x/h) to bfloat16 here
        # to halve weight streaming; kept f32 for this tiny, latency-bound size.

        # [1, 0, ..., 0] tail appended to the flattened x (closure constant).
        tail = np.zeros((1, self.s_pad - self.size), np.float32)
        tail[0, 0] = 1.0
        self._aug_tail = jnp.asarray(tail)

        # torch.ones(1, hidden_size), stored lane-padded so it can be aliased
        # in place by the kernel with no per-step pad/slice.
        self._h_pad_state = jnp.zeros((1, self.h_pad), jnp.float32
                                      ).at[0, :self.hidden_size].set(1.0)

        # ---- static nearest-upsample index maps (torch mode='nearest') ----
        in_h, in_w = self.rnn_output_shape[-2:]
        out_h = out_w = self.scaling_factor    # nn.Upsample(size=scaling_factor)
        self._up_rows = (np.arange(out_h) * in_h) // out_h
        self._up_cols = (np.arange(out_w) * in_w) // out_w
        upsample_identity = (out_h == in_h) and (out_w == in_w)
        # In the only shape-consistent torch configuration the whole epilogue
        # (reshape -> resize -> upsample -> add) collapses to a residual add,
        # which is fused into the kernel.
        self._fully_fused = (not self.resize_output) and upsample_identity

        self._step = self._build_pallas_step()
        # Pure jitted forward; the padded hidden state is donated so the pallas
        # alias (h in -> h out) really is in place.
        self._forward = jax.jit(self._pure_forward, donate_argnums=(1,))

    # --- pallas call --------------------------------------------------------
    def _build_pallas_step(self):
        s_pad, h_pad = self.s_pad, self.h_pad

        # 1-D grid over output-lane tiles.  At small H this is a single block
        # (grid=(1,), zero pipelining overhead); at large H, 512-1024-lane tiles
        # keep two double-buffered weight slabs inside VMEM on every generation
        # and overlap the weight DMA with the MXU.
        if h_pad <= 1024:
            tile_h = h_pad
        else:
            tile_h = next(t for t in (1024, 512, 256, 128) if h_pad % t == 0)
        grid = (h_pad // tile_h,)

        # VMEM budget guard (review): v7x has 64 MiB physical VMEM and v5e's
        # default scoped limit is only 16 MiB -> size the limit from the actual
        # double-buffered working set, floor 32 MiB, cap 48 MiB.
        block_bytes = 4 * (s_pad * tile_h + h_pad * tile_h     # weight tiles
                           + s_pad + h_pad + tile_h            # x_aug, h, x_res
                           + 2 * tile_h)                       # y, h_new
        vmem_limit = int(min(max(4 * 2 * block_bytes, 32 * 1024 * 1024),
                             48 * 1024 * 1024))

        flops = 2 * (s_pad + h_pad) * h_pad + 2 * h_pad
        bytes_accessed = 4 * ((s_pad + h_pad) * h_pad + s_pad + 4 * h_pad)
        cost = pl.CostEstimate(flops=flops, transcendentals=h_pad,
                               bytes_accessed=bytes_accessed)

        # Alias h_in -> h_new only in the single-block case, where the full
        # hidden row is read into VMEM before any output writeback can land.
        io_aliases = {1: 1} if grid[0] == 1 else {}
        # Single TensorCore at small sizes (review); shard the H tiles across
        # cores only once the step is genuinely weight-streaming bound.
        semantics = ("arbitrary",) if grid[0] == 1 else ("parallel",)

        return pl.pallas_call(
            _fused_addrnn_kernel,
            grid=grid,
            in_specs=[
                pl.BlockSpec((1, s_pad), lambda j: (0, 0)),        # x_aug (GEMV lhs)
                pl.BlockSpec((1, h_pad), lambda j: (0, 0)),        # h (full row)
                pl.BlockSpec((s_pad, tile_h), lambda j: (0, j)),   # Wx column tile
                pl.BlockSpec((h_pad, tile_h), lambda j: (0, j)),   # Wh column tile
                pl.BlockSpec((1, tile_h), lambda j: (0, j)),       # x lanes (residual)
            ],
            out_specs=[
                pl.BlockSpec((1, tile_h), lambda j: (0, j)),       # y = x + tanh(.)
                pl.BlockSpec((1, tile_h), lambda j: (0, j)),       # new hidden
            ],
            out_shape=[
                jax.ShapeDtypeStruct((1, h_pad), jnp.float32),
                jax.ShapeDtypeStruct((1, h_pad), jnp.float32),
            ],
            input_output_aliases=io_aliases,
            compiler_params=pltpu.CompilerParams(
                dimension_semantics=semantics,
                vmem_limit_bytes=vmem_limit),
            cost_estimate=cost,
        )

    # --- forward ------------------------------------------------------------
    def _pure_forward(self, x, h_pad_state):
        x_row = jnp.reshape(x, (1, -1)).astype(jnp.float32)
        # [x_flat, 1, 0...]: one tiny fused lane-pad; no 8-sublane pad, no concat
        # with h on the host.
        x_aug = jnp.concatenate([x_row, self._aug_tail], axis=1)       # (1, S_pad)
        y_pad, h_new_pad = self._step(x_aug, h_pad_state, self._wx, self._wh, x_aug)

        if self._fully_fused:
            # Kernel already holds x_flat + h_new in lanes [:hidden]; slice off
            # the lane padding and reshape (contiguous) to input_shape.
            out = jnp.reshape(y_pad[0, :self.hidden_size], self.input_shape)
        else:
            # Generic (never shape-consistent in torch) epilogue using static
            # numpy index maps: reshape -> np.resize -> nearest upsample -> add.
            y = jnp.reshape(h_new_pad[0, :self.hidden_size], self.input_shape)
            if self.resize_output:
                y = jnp.resize(y, self.rnn_output_shape)
            y = y[..., self._up_rows[:, None], self._up_cols[None, :]]
            out = x + y
        return out, h_new_pad

    def __call__(self, x):
        out, new_h = self._forward(x, self._h_pad_state)
        self._h_pad_state = new_h      # state update outside jit (pure inside)
        return out

    @property
    def hidden_state(self):
        return self._h_pad_state[:, :self.hidden_size]


if __name__ == "__main__":
    # The torch module is only shape-consistent when scaling_factor == 2 (so the
    # Rnn reshape of the (1, hidden) output to input_shape works) and the
    # spatial dims equal scaling_factor (so Upsample(size=2) adds to x).  Hence:
    input_shape = [2, 4, 2, 2]          # N, C, H, W  -> size = hidden_size = 32
    scaling_factor = 2

    x = jax.random.normal(jax.random.PRNGKey(0), tuple(input_shape),
                          dtype=jnp.float32)
    model = AddRnnPallas(input_shape, scaling_factor, seed=0)

    # Snapshot parameters / initial state BEFORE the call: the padded hidden
    # buffer is donated to the fused kernel (aliased in place).
    w_ih = np.asarray(model.w_ih)
    w_hh = np.asarray(model.w_hh)
    b = np.asarray(model.b_ih + model.b_hh)
    h0 = np.ones((1, model.hidden_size), np.float32)
    x_np = np.asarray(x)

    out = model(x)
    out = jax.block_until_ready(out)

    assert out.shape == tuple(input_shape)
    assert model.hidden_state.shape == (1, model.hidden_size)

    # Full-precision numpy reference of the same math (Upsample(size=2) on the
    # 2x2 spatial dims is the identity; the np.resize path is inactive).
    h_ref = np.tanh(x_np.reshape(1, -1) @ w_ih.T + h0 @ w_hh.T + b)
    y_ref = x_np + h_ref.reshape(tuple(input_shape))
    np.testing.assert_allclose(np.asarray(out), y_ref, rtol=2e-2, atol=2e-2)
    np.testing.assert_allclose(np.asarray(model.hidden_state), h_ref,
                               rtol=2e-2, atol=2e-2)

    print("KERNEL_OK")
</pallas_src>

<mosaic_0001>
module attributes {stable_mosaic.version = 11 : i64} {
  func.func @_fused_addrnn_kernel(%arg0: i32, %arg1: memref<1x128xf32, #tpu.memory_space<vmem>>, %arg2: memref<1x128xf32, #tpu.memory_space<vmem>>, %arg3: memref<128x128xf32, #tpu.memory_space<vmem>>, %arg4: memref<128x128xf32, #tpu.memory_space<vmem>>, %arg5: memref<1x128xf32, #tpu.memory_space<vmem>>, %arg6: memref<1x128xf32, #tpu.memory_space<vmem>>, %arg7: memref<1x128xf32, #tpu.memory_space<vmem>>) attributes {dimension_semantics = [#tpu.dimension_semantics<arbitrary>], iteration_bounds = array<i64: 1>, scalar_prefetch = 0 : i64, scratch_operands = 0 : i64, tpu.core_type = #tpu.core_type<tc>, window_params = [{pipeline_mode = #tpu.pipeline_mode<synchronous>, transform_indices = @transform_0, window_bounds = array<i64: 1, 128>}, {pipeline_mode = #tpu.pipeline_mode<synchronous>, transform_indices = @transform_1, window_bounds = array<i64: 1, 128>}, {transform_indices = @transform_2, window_bounds = array<i64: 128, 128>}, {transform_indices = @transform_3, window_bounds = array<i64: 128, 128>}, {transform_indices = @transform_4, window_bounds = array<i64: 1, 128>}, {transform_indices = @transform_5, window_bounds = array<i64: 1, 128>}, {transform_indices = @transform_6, window_bounds = array<i64: 1, 128>}]} {
    %c0 = arith.constant 0 : index
    %c0_0 = arith.constant 0 : index
    %0 = vector.load %arg1[%c0, %c0_0] : memref<1x128xf32, #tpu.memory_space<vmem>>, vector<1x128xf32>
    %c0_1 = arith.constant 0 : index
    %c0_2 = arith.constant 0 : index
    %1 = vector.load %arg3[%c0_1, %c0_2] : memref<128x128xf32, #tpu.memory_space<vmem>>, vector<128x128xf32>
    %cst = arith.constant dense<0.000000e+00> : vector<1x128xf32>
    %2 = tpu.matmul %0, %1, %cst {dimension_numbers = #tpu.dot_dimension_numbers<[1], [0], [0], [1], [0, 0, 1, 1], [], []>} : vector<1x128xf32>, vector<128x128xf32>, vector<1x128xf32> -> vector<1x128xf32>
    %c0_3 = arith.constant 0 : index
    %c0_4 = arith.constant 0 : index
    %3 = vector.load %arg2[%c0_3, %c0_4] : memref<1x128xf32, #tpu.memory_space<vmem>>, vector<1x128xf32>
    %c0_5 = arith.constant 0 : index
    %c0_6 = arith.constant 0 : index
    %4 = vector.load %arg4[%c0_5, %c0_6] : memref<128x128xf32, #tpu.memory_space<vmem>>, vector<128x128xf32>
    %cst_7 = arith.constant dense<0.000000e+00> : vector<1x128xf32>
    %5 = tpu.matmul %3, %4, %cst_7 {dimension_numbers = #tpu.dot_dimension_numbers<[1], [0], [0], [1], [0, 0, 1, 1], [], []>} : vector<1x128xf32>, vector<128x128xf32>, vector<1x128xf32> -> vector<1x128xf32>
    %6 = arith.addf %2, %5 : vector<1x128xf32>
    %7 = math.tanh %6 : vector<1x128xf32>
    %c0_8 = arith.constant 0 : index
    %c0_9 = arith.constant 0 : index
    %8 = vector.load %arg7[%c0_8, %c0_9] : memref<1x128xf32, #tpu.memory_space<vmem>>, vector<1x128xf32>
    tpu.vector_store %arg7[%c0_8, %c0_9], %7 {strides = array<i32>} : memref<1x128xf32, #tpu.memory_space<vmem>>, vector<1x128xf32>,
    %c0_10 = arith.constant 0 : index
    %c0_11 = arith.constant 0 : index
    %9 = vector.load %arg5[%c0_10, %c0_11] : memref<1x128xf32, #tpu.memory_space<vmem>>, vector<1x128xf32>
    %10 = arith.addf %9, %7 : vector<1x128xf32>
    %c0_12 = arith.constant 0 : index
    %c0_13 = arith.constant 0 : index
    %11 = vector.load %arg6[%c0_12, %c0_13] : memref<1x128xf32, #tpu.memory_space<vmem>>, vector<1x128xf32>
    tpu.vector_store %arg6[%c0_12, %c0_13], %10 {strides = array<i32>} : memref<1x128xf32, #tpu.memory_space<vmem>>, vector<1x128xf32>,
    return
  }
  func.func @transform_0(%arg0: i32) -> (i32, i32) {
    %c0_i32 = arith.constant 0 : i32
    %c0_i32_0 = arith.constant 0 : i32
    %c0_i32_1 = arith.constant 0 : i32
    return %c0_i32, %c0_i32_0 : i32, i32
  }
  func.func @transform_1(%arg0: i32) -> (i32, i32) {
    %c0_i32 = arith.constant 0 : i32
    %c0_i32_0 = arith.constant 0 : i32
    %c0_i32_1 = arith.constant 0 : i32
    return %c0_i32, %c0_i32_0 : i32, i32
  }
  func.func @transform_2(%arg0: i32) -> (i32, i32) {
    %c0_i32 = arith.constant 0 : i32
    %c0_i32_0 = arith.constant 0 : i32
    return %c0_i32, %arg0 : i32, i32
  }
  func.func @transform_3(%arg0: i32) -> (i32, i32) {
    %c0_i32 = arith.constant 0 : i32
    %c0_i32_0 = arith.constant 0 : i32
    return %c0_i32, %arg0 : i32, i32
  }
  func.func @transform_4(%arg0: i32) -> (i32, i32) {
    %c0_i32 = arith.constant 0 : i32
    %c0_i32_0 = arith.constant 0 : i32
    return %c0_i32, %arg0 : i32, i32
  }
  func.func @transform_5(%arg0: i32) -> (i32, i32) {
    %c0_i32 = arith.constant 0 : i32
    %c0_i32_0 = arith.constant 0 : i32
    return %c0_i32, %arg0 : i32, i32
  }
  func.func @transform_6(%arg0: i32) -> (i32, i32) {
    %c0_i32 = arith.constant 0 : i32
    %c0_i32_0 = arith.constant 0 : i32
    return %c0_i32, %arg0 : i32, i32
  }
}

</mosaic_0001>

<bundles_post_ra>
// kernel: squeeze.1
= control target key start
LH: loop header
LB: loop body
LE: loop exit
PB: predicated region body
PF: predicated region fallthrough
CT: control target
= control target key end

     0   :  { %s175_s8 = smov 122   ;;  %vm7_vm0 = vcmask 15360   ;;  %s176_s9 = smov 124   ;;  %s242_s0 = inlined_call_operand.vmem [shape: f32[32], index: 0, kind: input, shape index: {}]   ;;  %s243_s1 = inlined_call_operand.vmem [shape: f32[2,4,2,2], index: 1, kind: output, shape index: {}]  }
   0x1   :  { %v4_v0 = vld [vmem:[%s242_s0] sm:$0x1]  ;;  %s174_s0 = smov 126   ;;  %s177_s10 = smov 120  }
   0x2   :  { %5 = vst [vmem:[#allocation1] sm:$0x1] %v4_v0  ;;  %s178_s11 = smov 118   ;;  %s179_s12 = smov 116  }
   0x3   :  { %s180_s13 = smov 114   ;;  %s181_s14 = smov 112  }
   0x4   :  { %s182_s15 = smov 110   ;;  %s183_s16 = smov 108  }
   0x5   :  { %s184_s17 = smov 106   ;;  %s185_s18 = smov 104  }
   0x6   :  { %s186_s19 = smov 102   ;;  %s187_s20 = smov 100  }
   0x7   :  { %s188_s21 = smov 98  }
   0x9   :  { %v9_v1 = vld [vmem:[#allocation1] sm:$0x1]  }
   0xa   :  { %v21_v2 = vld [vmem:[#allocation1] sm:$0x1]   ;;  %10 = vrot.lane.b32.xlu0 %v9_v1, %s174_s0 }
   0xb   :  { %22 = vrot.lane.b32.xlu1 %v21_v2, %s175_s8  ;;  %v15_v3 = vld [vmem:[#allocation1] sm:$0x1]  }
   0xc   :  { %v27_v4 = vld [vmem:[#allocation1] sm:$0x1]  }
   0xd   :  { %v6_v5 = vld [vmem:[#allocation1] sm:$0x1]  }
   0xe   :  { %16 = vrot.lane.b32.xlu0 %v15_v3, %s176_s9  ;;  %v33_v6 = vld [vmem:[#allocation1] sm:$0x1]   ;;  %8 = vst.msk [vmem:[#allocation0] sm:$0x1] %vm7_vm0, %v6_v5  }
   0xf   :  { %28 = vrot.lane.b32.xlu1 %v27_v4, %s177_s10  ;;  %v39_v7 = vld [vmem:[#allocation1] sm:$0x1]  }
  0x10   :  { %v45_v8 = vld [vmem:[#allocation1] sm:$0x1]  }
  0x11   :  { %v51_v9 = vld [vmem:[#allocation1] sm:$0x1]  }
  0x12   :  { %34 = vrot.lane.b32.xlu0 %v33_v6, %s178_s11  ;;  %v57_v10 = vld [vmem:[#allocation1] sm:$0x1]  }
  0x13   :  { %40 = vrot.lane.b32.xlu1 %v39_v7, %s179_s12  ;;  %v63_v11 = vld [vmem:[#allocation1] sm:$0x1]  }
  0x14   :  { %v69_v12 = vld [vmem:[#allocation1] sm:$0x1]  }
  0x15   :  { %v75_v13 = vld [vmem:[#allocation1] sm:$0x1]  }
  0x16   :  { %46 = vrot.lane.b32.xlu0 %v45_v8, %s180_s13  ;;  %v81_v14 = vld [vmem:[#allocation1] sm:$0x1]  }
  0x17   :  { %52 = vrot.lane.b32.xlu1 %v51_v9, %s181_s14  ;;  %v87_v15 = vld [vmem:[#allocation1] sm:$0x1]  }
  0x18   :  { %v93_v16 = vld [vmem:[#allocation1] sm:$0x1]  }
  0x1a   :  { %58 = vrot.lane.b32.xlu0 %v57_v10, %s182_s15 }
  0x1b   :  { %64 = vrot.lane.b32.xlu1 %v63_v11, %s183_s16 }
  0x1e   :  { %70 = vrot.lane.b32.xlu0 %v69_v12, %s184_s17 }
  0x1f   :  { %76 = vrot.lane.b32.xlu1 %v75_v13, %s185_s18 }
  0x22   :  { %82 = vrot.lane.b32.xlu0 %v81_v14, %s186_s19 }
  0x23   :  { %88 = vrot.lane.b32.xlu1 %v87_v15, %s187_s20 }
  0x26   :  { %94 = vrot.lane.b32.xlu0 %v93_v16, %s188_s21 }
  0x7c   :  { %v11_v17 = vpop.permute.xlu0 %10  }
  0x7d   :  { %v23_v18 = vpop.permute.xlu1 %22   ;;  %14 = vst.msk [vmem:[#allocation0 + $0x1] sm:$0x1] %vm7_vm0, %v11_v17  }
  0x7e   :  { %26 = vst.msk [vmem:[#allocation0 + $0x9] sm:$0x1] %vm7_vm0, %v23_v18  }
  0x80   :  { %v17_v19 = vpop.permute.xlu0 %16  }
  0x81   :  { %v29_v20 = vpop.permute.xlu1 %28   ;;  %20 = vst.msk [vmem:[#allocation0 + $0x8] sm:$0x1] %vm7_vm0, %v17_v19  }
  0x82   :  { %32 = vst.msk [vmem:[#allocation0 + $0x10] sm:$0x1] %vm7_vm0, %v29_v20  }
  0x84   :  { %v102_v21 = vld [vmem:[#allocation0] sm:$0x3]  ;;  %v35_v22 = vpop.permute.xlu0 %34  }
  0x85   :  { %v41_v23 = vpop.permute.xlu1 %40   ;;  %104 = vst [vmem:[%s243_s1] sm:$0x3] %v102_v21  ;;  %38 = vst.msk [vmem:[#allocation0 + $0x11] sm:$0x1] %vm7_vm0, %v35_v22  }
  0x86   :  { %44 = vst.msk [vmem:[#allocation0 + $0x18] sm:$0x1] %vm7_vm0, %v41_v23  }
  0x88   :  { %v106_v24 = vld [vmem:[#allocation0 + $0x8] sm:$0x3]  ;;  %v47_v25 = vpop.permute.xlu0 %46  }
  0x89   :  { %v53_v26 = vpop.permute.xlu1 %52   ;;  %152 = vst [vmem:[%s243_s1 + $0x2] sm:$0x3] %v106_v24  ;;  %50 = vst.msk [vmem:[#allocation0 + $0x19] sm:$0x1] %vm7_vm0, %v47_v25  }
  0x8a   :  { %56 = vst.msk [vmem:[#allocation0 + $0x20] sm:$0x1] %vm7_vm0, %v53_v26  }
  0x8c   :  { %v111_v27 = vld [vmem:[#allocation0 + $0x10] sm:$0x3]  ;;  %v59_v28 = vpop.permute.xlu0 %58  }
  0x8d   :  { %v65_v29 = vpop.permute.xlu1 %64   ;;  %153 = vst [vmem:[%s243_s1 + $0x4] sm:$0x3] %v111_v27  ;;  %62 = vst.msk [vmem:[#allocation0 + $0x21] sm:$0x1] %vm7_vm0, %v59_v28  }
  0x8e   :  { %68 = vst.msk [vmem:[#allocation0 + $0x28] sm:$0x1] %vm7_vm0, %v65_v29  }
  0x90   :  { %v117_v30 = vld [vmem:[#allocation0 + $0x18] sm:$0x3]  ;;  %v71_v31 = vpop.permute.xlu0 %70  }
  0x91   :  { %v77_v32 = vpop.permute.xlu1 %76   ;;  %154 = vst [vmem:[%s243_s1 + $0x6] sm:$0x3] %v117_v30  ;;  %74 = vst.msk [vmem:[#allocation0 + $0x29] sm:$0x1] %vm7_vm0, %v71_v31  }
  0x92   :  { %80 = vst.msk [vmem:[#allocation0 + $0x30] sm:$0x1] %vm7_vm0, %v77_v32  }
  0x94   :  { %v123_v33 = vld [vmem:[#allocation0 + $0x20] sm:$0x3]  ;;  %v83_v34 = vpop.permute.xlu0 %82  }
  0x95   :  { %v89_v35 = vpop.permute.xlu1 %88   ;;  %155 = vst [vmem:[%s243_s1 + $0x8] sm:$0x3] %v123_v33  ;;  %86 = vst.msk [vmem:[#allocation0 + $0x31] sm:$0x1] %vm7_vm0, %v83_v34  }
  0x96   :  { %92 = vst.msk [vmem:[#allocation0 + $0x38] sm:$0x1] %vm7_vm0, %v89_v35  }
  0x98   :  { %v129_v36 = vld [vmem:[#allocation0 + $0x28] sm:$0x3]  ;;  %v95_v37 = vpop.permute.xlu0 %94  }
  0x99   :  { %156 = vst [vmem:[%s243_s1 + $0xa] sm:$0x3] %v129_v36  ;;  %98 = vst.msk [vmem:[#allocation0 + $0x39] sm:$0x1] %vm7_vm0, %v95_v37  }
  0x9c   :  { %v135_v38 = vld [vmem:[#allocation0 + $0x30] sm:$0x3] }
  0x9d   :  { %157 = vst [vmem:[%s243_s1 + $0xc] sm:$0x3] %v135_v38 }
  0xa0   :  { %v141_v39 = vld [vmem:[#allocation0 + $0x38] sm:$0x3] }
  0xa1   :  { %158 = vst [vmem:[%s243_s1 + $0xe] sm:$0x3] %v141_v39 }

// kernel: _pure_forward.1
= control target key start
LH: loop header
LB: loop body
LE: loop exit
PB: predicated region body
PF: predicated region fallthrough
CT: control target
= control target key end

     0   :  { %12 = vsyncpa [#allocation3], 0  ;;  %s546_s0 = inlined_call_operand.vmem [shape: f32[1,128], index: 0, kind: input, shape index: {}, may-alias: {0,4}]   ;;  %s547_s1 = inlined_call_operand.vmem [shape: f32[1,128], index: 1, kind: input, shape index: {}, may-alias: {1,6}]   ;;  %s548_s2 = inlined_call_operand.hbm [shape: f32[128,128], index: 2, kind: input, shape index: {}]   ;;  %s549_s3 = inlined_call_operand.hbm [shape: f32[128,128], index: 3, kind: input, shape index: {}]   ;;  %s550_s4 = inlined_call_operand.vmem [shape: f32[1,128], index: 4, kind: input, shape index: {}, may-alias: {0,4}]   ;;  %s551_s5 = inlined_call_operand.vmem [shape: f32[1,128], index: 5, kind: output, shape index: {0}]   ;;  %s552_s6 = inlined_call_operand.vmem [shape: f32[1,128], index: 6, kind: output, shape index: {1}, may-alias: {1,6}]  }
   0x1   :  { %13 = vsyncpa [#allocation5], 0  ;;  %s449_s21 = smov [#allocation2]   ;;  %s401_s25 = scalar_lea.hbm %s548_s2, 2048 }
   0x2   :  { %s23_s22 = sshll.u32 %s449_s21, 4  ;;  %p402_p0 = scmp.ne.s32.totalorder %s548_s2, %s401_s25  ;;  %s24_s22 = int_to_ptr.vmem [resolvable:$true] %s23_s22 }
   0x3   :  { %p405_p1 = scmp.lt.u32.totalorder %s401_s25, %s548_s2 }
   0x5   :  { %p407_p2 = pnand %p405_p1, %p402_p0 }
   0x7   :  { %410 = shalt.err (!%p407_p2)
}
   0x8   :  { %s411_s30 = scalar_lea.vmem %s24_s22, 2048  ;;  %p416_p4 = scmp.lt.s32.totalorder %s24_s22, %s24_s22 }
   0x9   :  { %p412_p3 = scmp.ne.s32.totalorder %s24_s22, %s411_s30  ;;  %p417_p5 = scmp.lt.s32.totalorder %s411_s30, %s411_s30 }
   0xb   :  { %p418_p6 = por %p417_p5, %p416_p4 }
   0xd   :  { %p419_p7 = pnand %p418_p6, %p412_p3 }
   0xf   :  { %422 = shalt.err (!%p419_p7)
}
  0x10   :  { %s450_s7 = smov 128   ;;  %s451_s8 = smov 8  }
  0x11   :  { %29 = dma.hbm_to_vmem [thread:$0]  %s548_s2, 2048, %s24_s22, [#allocation3], %s450_s7, %s450_s7, %s451_s8  }
  0x12   :  { %s452_s11 = smov [#allocation4]   ;;  %s423_s15 = scalar_lea.hbm %s549_s3, 2048 }
  0x13   :  { %s35_s12 = sshll.u32 %s452_s11, 4  ;;  %p424_p8 = scmp.ne.s32.totalorder %s549_s3, %s423_s15  ;;  %s36_s12 = int_to_ptr.vmem [resolvable:$true] %s35_s12 }
  0x14   :  { %p427_p9 = scmp.lt.u32.totalorder %s423_s15, %s549_s3 }
  0x16   :  { %p429_p10 = pnand %p427_p9, %p424_p8 }
  0x18   :  { %432 = shalt.err (!%p429_p10)
}
  0x19   :  { %s433_s20 = scalar_lea.vmem %s36_s12, 2048  ;;  %p438_p12 = scmp.lt.s32.totalorder %s36_s12, %s36_s12 }
  0x1a   :  { %p434_p11 = scmp.ne.s32.totalorder %s36_s12, %s433_s20  ;;  %p439_p13 = scmp.lt.s32.totalorder %s433_s20, %s433_s20 }
  0x1c   :  { %p440_p0 = por %p439_p13, %p438_p12 }
  0x1e   :  { %p441_p1 = pnand %p440_p0, %p434_p11 }
  0x20   :  { %444 = shalt.err (!%p441_p1)
}
  0x21   :  { %41 = dma.hbm_to_vmem [thread:$0]  %s549_s3, 2048, %s36_s12, [#allocation5], %s450_s7, %s450_s7, %s451_s8  }
  0x22   :  { %445 = dma.done.wait [#allocation3], 2048  }
  0x23   :  { %446 = vsyncadd [#allocation3], 4294965248 }
  0x24   :  { %447 = dma.done.wait [#allocation5], 2048  }
  0x25   :  { %448 = vsyncadd [#allocation5], 4294965248  ;;  %v453_v0 = vmov 0.0|0.0   ;;  %vm454_vm0 = vmmov 0   ;;  %v455_v1 = vmov 0.0   ;;  %v68_v2 = vld [vmem:[#allocation4] sm:$0xff] }
  0x26   :  { %343 = vmatprep.subr.bf16.mxu1 %v453_v0  ;;  %367 = vmatprep.subr.bf16.mxu0 %v453_v0  ;;  %v69_v3 = vld [vmem:[#allocation4 + $0x8] sm:$0xff]  ;;  %v51_v4 = vld [vmem:[#allocation2] sm:$0xff]  ;;  %v70_v7 = vld [vmem:[#allocation4 + $0x10] sm:$0xff] }
  0x27   :  { %305 = vmatprep.mubr.msk.f32.mxu1 %vm454_vm0, %v455_v1  ;;  %340 = vmatprep.mubr.msk.f32.mxu0 %vm454_vm0, %v455_v1  ;;  %v344_v5 = vpack.c.bf16 %v69_v3, %v68_v2  ;;  %v52_v6 = vld [vmem:[#allocation2 + $0x8] sm:$0xff]  ;;  %v71_v8 = vld [vmem:[#allocation4 + $0x18] sm:$0xff]  ;;  %v53_v10 = vld [vmem:[#allocation2 + $0x10] sm:$0xff] }
  0x28   :  { %v368_v9 = vpack.c.bf16 %v52_v6, %v51_v4  ;;  %v54_v11 = vld [vmem:[#allocation2 + $0x18] sm:$0xff]  ;;  %v347_v12 = vpack.c.bf16 %v71_v8, %v70_v7  ;;  %v72_v14 = vld [vmem:[#allocation4 + $0x20] sm:$0xff]  ;;  %v73_v15 = vld [vmem:[#allocation4 + $0x28] sm:$0xff] }
  0x29   :  { %345 = vmatpush3.bf16.msra.mxu1 %v344_v5  ;;  %v371_v13 = vpack.c.bf16 %v54_v11, %v53_v10  ;;  %v55_v16 = vld [vmem:[#allocation2 + $0x20] sm:$0xff]  ;;  %v56_v17 = vld [vmem:[#allocation2 + $0x28] sm:$0xff]  ;;  %v350_v18 = vpack.c.bf16 %v73_v15, %v72_v14  ;;  %v74_v20 = vld [vmem:[#allocation4 + $0x30] sm:$0xff] }
  0x2a   :  { %369 = vmatpush3.bf16.msra.mxu0 %v368_v9  ;;  %346 = vmatprep.subr.bf16.mxu1 %v453_v0  ;;  %v374_v19 = vpack.c.bf16 %v56_v17, %v55_v16  ;;  %v75_v21 = vld [vmem:[#allocation4 + $0x38] sm:$0xff]  ;;  %v57_v22 = vld [vmem:[#allocation2 + $0x30] sm:$0xff]  ;;  %v76_v26 = vld [vmem:[#allocation4 + $0x40] sm:$0xff] }
  0x2b   :  { %370 = vmatprep.subr.bf16.mxu0 %v453_v0  ;;  %v58_v23 = vld [vmem:[#allocation2 + $0x38] sm:$0xff]  ;;  %v353_v24 = vpack.c.bf16 %v75_v21, %v74_v20  ;;  %v77_v27 = vld [vmem:[#allocation4 + $0x48] sm:$0xff]  ;;  %v59_v28 = vld [vmem:[#allocation2 + $0x40] sm:$0xff] }
  0x2c   :  { %v377_v25 = vpack.c.bf16 %v58_v23, %v57_v22  ;;  %v60_v29 = vld [vmem:[#allocation2 + $0x48] sm:$0xff]  ;;  %v356_v30 = vpack.c.bf16 %v77_v27, %v76_v26  ;;  %v78_v32 = vld [vmem:[#allocation4 + $0x50] sm:$0xff]  ;;  %v79_v33 = vld [vmem:[#allocation4 + $0x58] sm:$0xff] }
  0x2d   :  { %348 = vmatpush3.bf16.msra.mxu1 %v347_v12  ;;  %v380_v31 = vpack.c.bf16 %v60_v29, %v59_v28  ;;  %v61_v34 = vld [vmem:[#allocation2 + $0x50] sm:$0xff]  ;;  %v62_v35 = vld [vmem:[#allocation2 + $0x58] sm:$0xff]  ;;  %v359_v36 = vpack.c.bf16 %v79_v33, %v78_v32  ;;  %v80_v38 = vld [vmem:[#allocation4 + $0x60] sm:$0xff] }
  0x2e   :  { %372 = vmatpush3.bf16.msra.mxu0 %v371_v13  ;;  %349 = vmatprep.subr.bf16.mxu1 %v453_v0  ;;  %v383_v37 = vpack.c.bf16 %v62_v35, %v61_v34  ;;  %v81_v39 = vld [vmem:[#allocation4 + $0x68] sm:$0xff]  ;;  %v63_v40 = vld [vmem:[#allocation2 + $0x60] sm:$0xff]  ;;  %v82_v44 = vld [vmem:[#allocation4 + $0x70] sm:$0xff] }
  0x2f   :  { %373 = vmatprep.subr.bf16.mxu0 %v453_v0  ;;  %v64_v41 = vld [vmem:[#allocation2 + $0x68] sm:$0xff]  ;;  %v362_v42 = vpack.c.bf16 %v81_v39, %v80_v38  ;;  %v83_v45 = vld [vmem:[#allocation4 + $0x78] sm:$0xff]  ;;  %v65_v46 = vld [vmem:[#allocation2 + $0x70] sm:$0xff] }
  0x30   :  { %v386_v43 = vpack.c.bf16 %v64_v41, %v63_v40  ;;  %v66_v47 = vld [vmem:[#allocation2 + $0x78] sm:$0xff]  ;;  %v365_v48 = vpack.c.bf16 %v83_v45, %v82_v44  ;;  %v67_v50 = vld [vmem:[%s547_s1] sm:$0x1] }
  0x31   :  { %351 = vmatpush3.bf16.msra.mxu1 %v350_v18  ;;  %v389_v49 = vpack.c.bf16 %v66_v47, %v65_v46  ;;  %v50_v51 = vld [vmem:[%s546_s0] sm:$0x1] }
  0x32   :  { %375 = vmatpush3.bf16.msra.mxu0 %v374_v19  ;;  %352 = vmatprep.subr.bf16.mxu1 %v453_v0  ;;  %v226_v57 = vld [vmem:[%s550_s4] sm:$0x1] }
  0x33   :  { %376 = vmatprep.subr.bf16.mxu0 %v453_v0 }
  0x35   :  { %354 = vmatpush3.bf16.msra.mxu1 %v353_v24 }
  0x36   :  { %378 = vmatpush3.bf16.msra.mxu0 %v377_v25  ;;  %355 = vmatprep.subr.bf16.mxu1 %v453_v0 }
  0x37   :  { %379 = vmatprep.subr.bf16.mxu0 %v453_v0 }
  0x39   :  { %357 = vmatpush3.bf16.msra.mxu1 %v356_v30 }
  0x3a   :  { %381 = vmatpush3.bf16.msra.mxu0 %v380_v31  ;;  %358 = vmatprep.subr.bf16.mxu1 %v453_v0 }
  0x3b   :  { %382 = vmatprep.subr.bf16.mxu0 %v453_v0 }
  0x3d   :  { %360 = vmatpush3.bf16.msra.mxu1 %v359_v36 }
  0x3e   :  { %384 = vmatpush3.bf16.msra.mxu0 %v383_v37  ;;  %361 = vmatprep.subr.bf16.mxu1 %v453_v0 }
  0x3f   :  { %385 = vmatprep.subr.bf16.mxu0 %v453_v0 }
  0x41   :  { %363 = vmatpush3.bf16.msra.mxu1 %v362_v42 }
  0x42   :  { %387 = vmatpush3.bf16.msra.mxu0 %v386_v43  ;;  %364 = vmatprep.subr.bf16.mxu1 %v453_v0 }
  0x43   :  { %388 = vmatprep.subr.bf16.mxu0 %v453_v0 }
  0x45   :  { %366 = vmatpush3.bf16.msra.mxu1 %v365_v48 }
  0x46   :  { %390 = vmatpush3.bf16.msra.mxu0 %v389_v49 }
  0x48   :  { %306 = vmatmul.mubr.f32.vlgmr.msra.gmra.mrb[0].mxu1 %v67_v50 }
  0x49   :  { %341 = vmatmul.mubr.f32.vlgmr.msra.gmra.mrb[0].mxu0 %v50_v51 }
 0x11b   :  { %v150_v52 = vpop.f32.mrb[0].mxu1 }
 0x11c   :  { %v220_v53 = vpop.f32.mrb[0].mxu0  ;;  %v307_v54 = vpop.f32.mrb[1].mxu1 }
 0x11d   :  { %v221_v55 = vadd.f32 %v220_v53, %v150_v52  ;;  %v342_v56 = vpop.f32.mrb[1].mxu0 }
 0x11f   :  { %399 = vtanh.f32 %v221_v55 }
 0x129   :  { %v400_v58 = vpop.eup %399 }
 0x12a   :  { %225 = vst [vmem:[%s552_s6] sm:$0x1] %v400_v58  ;;  %v227_v59 = vadd.f32 %v400_v58, %v226_v57 }
 0x12c   :  { %228 = vst [vmem:[%s551_s5] sm:$0x1] %v227_v59 }
 0x12d   :  { %237 = vsyncpa [#allocation3], 1 }
 0x12e   :  { %238 = vsyncpa [#allocation5], 1 }

</bundles_post_ra>
